<compile_context>
chip_gen: v6e
topology: v6e:2x2x1
jax: 0.10.0
libtpu: 0.0.40
codegen_flags: <defaults>
</compile_context>

<pallas_src>
import functools
import math

import jax
import jax.numpy as jnp
from jax.experimental import pallas as pl
from jax.experimental.pallas import tpu as pltpu

_EPS = 1e-7
_LANES = 128
_SUBLANES = 8


def _round_up(x, m):
    return ((x + m - 1) // m) * m


# ----------------------------------------------------------------------------
# Kernel: per-tile weighted BCE, folded into a resident (8,128) accumulator.
# ----------------------------------------------------------------------------
def _wbce_kernel(yt_ref, yp_ref, out_ref, acc_ref, *,
                 weight_positive, n_valid, tm, needs_mask):
    i = pl.program_id(0)

    @pl.when(i == 0)
    def _init():
        acc_ref[...] = jnp.zeros_like(acc_ref)

    yt = yt_ref[...].astype(jnp.float32)
    yp = yp_ref[...].astype(jnp.float32)

    loss = -(weight_positive * yt * jnp.log(yp + _EPS)
             + (1.0 - yt) * jnp.log(1.0 - yp + _EPS))

    if needs_mask:
        # Zero contributions from the padded tail (branch-free VPU select).
        row_ids = jax.lax.broadcasted_iota(jnp.int32, (tm, _LANES), 0)
        lane_ids = jax.lax.broadcasted_iota(jnp.int32, (tm, _LANES), 1)
        gidx = (i * tm + row_ids) * _LANES + lane_ids
        loss = jnp.where(gidx < n_valid, loss, 0.0)

    # Fold (tm, 128) -> (8, 128) with vreg-wise VPU adds (no XLU work here).
    acc_ref[...] += loss.reshape(tm // _SUBLANES, _SUBLANES, _LANES).sum(axis=0)

    @pl.when(i == pl.num_programs(0) - 1)
    def _finalize():
        # Single cross-lane/sublane reduce for the whole kernel.
        out_ref[...] = (jnp.sum(acc_ref[...]) * (1.0 / n_valid)).reshape(1, 1)


# ----------------------------------------------------------------------------
# Wrapper: flatten -> lane-dense [rows, 128] -> tiled, pipelined reduction.
# ----------------------------------------------------------------------------
def weighted_bce_loss(y_true, y_pred, *, weight_positive, block_rows=2048):
    assert y_true.shape == y_pred.shape, "y_true / y_pred shape mismatch"
    n = math.prod(y_true.shape) if y_true.shape else 1
    n = max(int(n), 1)

    # Mirror the PyTorch `.to(float32)` for non-floating labels; keep floating
    # inputs in their native dtype so bf16/f16 stream at half the HBM bytes.
    def _as_float(x):
        return x if jnp.issubdtype(x.dtype, jnp.floating) else x.astype(jnp.float32)

    yt = _as_float(y_true).reshape(-1)
    yp = _as_float(y_pred).reshape(-1)

    rows = max(-(-n // _LANES), 1)
    num_tiles = max(-(-rows // int(block_rows)), 1)
    tm = _round_up(-(-rows // num_tiles), 32)      # 32-row align: f32/bf16/f16/i8 safe
    rows_padded = num_tiles * tm
    total_padded = rows_padded * _LANES
    pad = total_padded - n
    if pad:
        yt = jnp.pad(yt, (0, pad))
        yp = jnp.pad(yp, (0, pad))
    yt = yt.reshape(rows_padded, _LANES)
    yp = yp.reshape(rows_padded, _LANES)

    kernel = functools.partial(
        _wbce_kernel,
        weight_positive=float(weight_positive),
        n_valid=n, tm=tm,
        needs_mask=(pad != 0))

    out = pl.pallas_call(
        kernel,
        out_shape=jax.ShapeDtypeStruct((1, 1), jnp.float32),
        grid_spec=pltpu.PrefetchScalarGridSpec(
            num_scalar_prefetch=0,
            grid=(num_tiles,),
            in_specs=[pl.BlockSpec((tm, _LANES), lambda i: (i, 0)),
                      pl.BlockSpec((tm, _LANES), lambda i: (i, 0))],
            out_specs=pl.BlockSpec((1, 1), lambda i: (0, 0)),
            scratch_shapes=[pltpu.VMEM((_SUBLANES, _LANES), jnp.float32)]),
        compiler_params=pltpu.CompilerParams(
            # Reduction into a shared accumulator -> grid axis is "arbitrary".
            dimension_semantics=("arbitrary",),
            # 2 inputs x 2 bufs x (2048*128*4B) = 4 MiB: explicit cap keeps the
            # same code safe on v7x's 64 MiB VMEM.
            vmem_limit_bytes=32 * 1024 * 1024),
        cost_estimate=pl.CostEstimate(
            flops=10 * total_padded,
            transcendentals=2 * total_padded,
            bytes_accessed=(yt.dtype.itemsize + yp.dtype.itemsize) * total_padded + 4),
    )(yt, yp)
    return out[0, 0]


# ----------------------------------------------------------------------------
# Pure-JAX reference (mirrors the PyTorch module exactly).
# ----------------------------------------------------------------------------
def weighted_bce_loss_ref(y_true, y_pred, weight_positive):
    y_true = y_true.astype(jnp.float32)
    y_pred = y_pred.astype(jnp.float32)
    loss = -(weight_positive * y_true * jnp.log(y_pred + _EPS)
             + (1.0 - y_true) * jnp.log(1.0 - y_pred + _EPS))
    return jnp.mean(loss)


if __name__ == "__main__":
    key = jax.random.PRNGKey(0)
    k1, k2, k3, k4, k5, k6 = jax.random.split(key, 6)

    weight_positive = 2.0
    loss_fn = jax.jit(
        lambda yt, yp: weighted_bce_loss(yt, yp, weight_positive=weight_positive))

    # Case 1: shapes consistent with the module's usage (sigmoid outputs),
    # batch=2, 32 outputs.
    B, C = 2, 32
    y_pred1 = jax.nn.sigmoid(jax.random.normal(k1, (B, C), jnp.float32))
    y_true1 = (jax.random.uniform(k2, (B, C)) > 0.5).astype(jnp.float32)
    out1 = jax.block_until_ready(loss_fn(y_true1, y_pred1))
    ref1 = weighted_bce_loss_ref(y_true1, y_pred1, weight_positive)
    assert out1.shape == ()
    assert bool(jnp.isfinite(out1))
    assert bool(jnp.allclose(out1, ref1, rtol=1e-5, atol=1e-6)), (out1, ref1)

    # Case 2: non-lane-aligned size to exercise the in-kernel padding mask.
    y_pred2 = jax.nn.sigmoid(jax.random.normal(k3, (3, 257), jnp.float32))
    y_true2 = (jax.random.uniform(k4, (3, 257)) > 0.5).astype(jnp.float32)
    out2 = jax.block_until_ready(loss_fn(y_true2, y_pred2))
    ref2 = weighted_bce_loss_ref(y_true2, y_pred2, weight_positive)
    assert bool(jnp.allclose(out2, ref2, rtol=1e-5, atol=1e-6)), (out2, ref2)

    # Case 3: bf16 predictions / int labels (native-dtype streaming path).
    y_pred3 = jax.nn.sigmoid(jax.random.normal(k5, (5, 300))).astype(jnp.bfloat16)
    y_true3 = (jax.random.uniform(k6, (5, 300)) > 0.5).astype(jnp.int32)
    out3 = jax.block_until_ready(
        weighted_bce_loss(y_true3, y_pred3, weight_positive=weight_positive))
    ref3 = weighted_bce_loss_ref(y_true3, y_pred3, weight_positive)
    assert bool(jnp.allclose(out3, ref3, rtol=2e-3, atol=2e-3)), (out3, ref3)

    print("KERNEL_OK")
</pallas_src>

<mosaic_0001>
module attributes {stable_mosaic.version = 11 : i64} {
  func.func @_wbce_kernel(%arg0: i32, %arg1: memref<32x128xf32, #tpu.memory_space<vmem>>, %arg2: memref<32x128xf32, #tpu.memory_space<vmem>>, %arg3: memref<1x1xf32, #tpu.memory_space<vmem>>, %arg4: memref<8x128xf32, #tpu.memory_space<vmem>>) attributes {dimension_semantics = [#tpu.dimension_semantics<arbitrary>], iteration_bounds = array<i64: 1>, scalar_prefetch = 0 : i64, scratch_operands = 1 : i64, tpu.core_type = #tpu.core_type<tc>, window_params = [{transform_indices = @transform_0, window_bounds = array<i64: 32, 128>}, {transform_indices = @transform_1, window_bounds = array<i64: 32, 128>}, {pipeline_mode = #tpu.pipeline_mode<synchronous>, transform_indices = @transform_2, window_bounds = array<i64: 1, 1>}]} {
    %c0_i32 = arith.constant 0 : i32
    %0 = arith.cmpi eq, %arg0, %c0_i32 : i32
    %1 = arith.extui %0 : i1 to i32
    %c0_i32_0 = arith.constant 0 : i32
    %2 = arith.cmpi ne, %1, %c0_i32_0 : i32
    scf.if %2 {
      %cst_17 = arith.constant 0.000000e+00 : f32
      %42 = vector.broadcast %cst_17 : f32 to vector<8x128xf32>
      %c0_18 = arith.constant 0 : index
      %c0_19 = arith.constant 0 : index
      %43 = vector.load %arg4[%c0_18, %c0_19] : memref<8x128xf32, #tpu.memory_space<vmem>>, vector<8x128xf32>
      tpu.vector_store %arg4[%c0_18, %c0_19], %42 {strides = array<i32>} : memref<8x128xf32, #tpu.memory_space<vmem>>, vector<8x128xf32>,
    } else {
    }
    %c0 = arith.constant 0 : index
    %c0_1 = arith.constant 0 : index
    %3 = vector.load %arg1[%c0, %c0_1] : memref<32x128xf32, #tpu.memory_space<vmem>>, vector<32x128xf32>
    %c0_2 = arith.constant 0 : index
    %c0_3 = arith.constant 0 : index
    %4 = vector.load %arg2[%c0_2, %c0_3] : memref<32x128xf32, #tpu.memory_space<vmem>>, vector<32x128xf32>
    %cst = arith.constant 2.000000e+00 : f32
    %5 = vector.broadcast %cst : f32 to vector<32x128xf32>
    %6 = arith.mulf %5, %3 : vector<32x128xf32>
    %cst_4 = arith.constant 1.000000e-07 : f32
    %7 = vector.broadcast %cst_4 : f32 to vector<32x128xf32>
    %8 = arith.addf %4, %7 : vector<32x128xf32>
    %9 = math.log %8 : vector<32x128xf32>
    %10 = arith.mulf %6, %9 : vector<32x128xf32>
    %cst_5 = arith.constant 1.000000e+00 : f32
    %11 = vector.broadcast %cst_5 : f32 to vector<32x128xf32>
    %12 = arith.subf %11, %3 : vector<32x128xf32>
    %cst_6 = arith.constant 1.000000e+00 : f32
    %13 = vector.broadcast %cst_6 : f32 to vector<32x128xf32>
    %14 = arith.subf %13, %4 : vector<32x128xf32>
    %cst_7 = arith.constant 1.000000e-07 : f32
    %15 = vector.broadcast %cst_7 : f32 to vector<32x128xf32>
    %16 = arith.addf %14, %15 : vector<32x128xf32>
    %17 = math.log %16 : vector<32x128xf32>
    %18 = arith.mulf %12, %17 : vector<32x128xf32>
    %19 = arith.addf %10, %18 : vector<32x128xf32>
    %cst_8 = arith.constant 0.000000e+00 : f32
    %20 = vector.broadcast %cst_8 : f32 to vector<32x128xf32>
    %21 = arith.subf %20, %19 : vector<32x128xf32>
    %22 = tpu.iota {dimensions = array<i32: 0>} : vector<32x128xi32>
    %23 = tpu.iota {dimensions = array<i32: 1>} : vector<32x128xi32>
    %c32_i32 = arith.constant 32 : i32
    %24 = arith.muli %arg0, %c32_i32 : i32
    %25 = vector.broadcast %24 : i32 to vector<32x128xi32>
    %26 = arith.addi %25, %22 : vector<32x128xi32>
    %c128_i32 = arith.constant 128 : i32
    %27 = vector.broadcast %c128_i32 : i32 to vector<32x128xi32>
    %28 = arith.muli %26, %27 : vector<32x128xi32>
    %29 = arith.addi %28, %23 : vector<32x128xi32>
    %c64_i32 = arith.constant 64 : i32
    %30 = vector.broadcast %c64_i32 : i32 to vector<32x128xi32>
    %31 = arith.cmpi slt, %29, %30 : vector<32x128xi32>
    %cst_9 = arith.constant 0.000000e+00 : f32
    %32 = vector.broadcast %cst_9 : f32 to vector<32x128xf32>
    %33 = arith.select %31, %21, %32 : vector<32x128xi1>, vector<32x128xf32>
    %c0_10 = arith.constant 0 : index
    %c0_11 = arith.constant 0 : index
    %34 = vector.load %arg4[%c0_10, %c0_11] : memref<8x128xf32, #tpu.memory_space<vmem>>, vector<8x128xf32>
    %35 = vector.shape_cast %33 : vector<32x128xf32> to vector<4x8x128xf32>
    %cst_12 = arith.constant dense<0.000000e+00> : vector<8x128xf32>
    %36 = vector.multi_reduction <add>, %35, %cst_12 [0] : vector<4x8x128xf32> to vector<8x128xf32>
    %37 = arith.addf %34, %36 : vector<8x128xf32>
    %c0_13 = arith.constant 0 : index
    %c0_14 = arith.constant 0 : index
    %38 = vector.load %arg4[%c0_13, %c0_14] : memref<8x128xf32, #tpu.memory_space<vmem>>, vector<8x128xf32>
    tpu.vector_store %arg4[%c0_13, %c0_14], %37 {strides = array<i32>} : memref<8x128xf32, #tpu.memory_space<vmem>>, vector<8x128xf32>,
    %c0_i32_15 = arith.constant 0 : i32
    %39 = arith.cmpi eq, %arg0, %c0_i32_15 : i32
    %40 = arith.extui %39 : i1 to i32
    %c0_i32_16 = arith.constant 0 : i32
    %41 = arith.cmpi ne, %40, %c0_i32_16 : i32
    scf.if %41 {
      %c0_17 = arith.constant 0 : index
      %c0_18 = arith.constant 0 : index
      %42 = vector.load %arg4[%c0_17, %c0_18] : memref<8x128xf32, #tpu.memory_space<vmem>>, vector<8x128xf32>
      %43 = vector.shape_cast %42 : vector<8x128xf32> to vector<1x8x128xf32>
      %cst_19 = arith.constant dense<0.000000e+00> : vector<1xf32>
      %44 = vector.multi_reduction <add>, %43, %cst_19 [1, 2] : vector<1x8x128xf32> to vector<1xf32>
      %45 = vector.shape_cast %44 : vector<1xf32> to vector<1x1x1xf32>
      %46 = vector.extract %45[0, 0, 0] : f32 from vector<1x1x1xf32>
      %cst_20 = arith.constant 1.562500e-02 : f32
      %47 = arith.mulf %46, %cst_20 : f32
      %48 = vector.broadcast %47 : f32 to vector<1x1xf32>
      %c0_21 = arith.constant 0 : index
      %c0_22 = arith.constant 0 : index
      %49 = vector.load %arg3[%c0_21, %c0_22] : memref<1x1xf32, #tpu.memory_space<vmem>>, vector<1x1xf32>
      tpu.vector_store %arg3[%c0_21, %c0_22], %48 {strides = array<i32>} : memref<1x1xf32, #tpu.memory_space<vmem>>, vector<1x1xf32>,
    } else {
    }
    return
  }
  func.func @transform_0(%arg0: i32) -> (i32, i32) {
    %c0_i32 = arith.constant 0 : i32
    %c0_i32_0 = arith.constant 0 : i32
    return %arg0, %c0_i32 : i32, i32
  }
  func.func @transform_1(%arg0: i32) -> (i32, i32) {
    %c0_i32 = arith.constant 0 : i32
    %c0_i32_0 = arith.constant 0 : i32
    return %arg0, %c0_i32 : i32, i32
  }
  func.func @transform_2(%arg0: i32) -> (i32, i32) {
    %c0_i32 = arith.constant 0 : i32
    %c0_i32_0 = arith.constant 0 : i32
    %c0_i32_1 = arith.constant 0 : i32
    return %c0_i32, %c0_i32_0 : i32, i32
  }
}

</mosaic_0001>

<bundles_post_ra>
// kernel: _lambda_.1
= control target key start
LH: loop header
LB: loop body
LE: loop exit
PB: predicated region body
PF: predicated region fallthrough
CT: control target
= control target key end

     0   :  { %s227_s0 = inlined_call_operand.vmem [shape: f32[32,128], index: 0, kind: input, shape index: {}]   ;;  %s228_s1 = inlined_call_operand.vmem [shape: f32[32,128], index: 1, kind: input, shape index: {}]   ;;  %s229_s2 = inlined_call_operand.hbm [shape: f32[1,1], index: 2, kind: output, shape index: {}]  }
   0x1   :  { %v21_v0 = vld [vmem:[%s228_s1] sm:$0xff]  ;;  %v22_v1 = vld [vmem:[%s228_s1 + $0x8] sm:$0xff]  ;;  %v23_v2 = vld [vmem:[%s228_s1 + $0x10] sm:$0xff] }
   0x2   :  { %v24_v3 = vld [vmem:[%s228_s1 + $0x18] sm:$0xff]  ;;  %v29_v4 = vadd.f32 1e-07, %v21_v0  ;;  %v30_v5 = vadd.f32 1e-07, %v22_v1 }
   0x3   :  { %v31_v6 = vadd.f32 1e-07, %v23_v2  ;;  %v32_v7 = vadd.f32 1e-07, %v24_v3 }
   0x4   :  { %146 = vlog2.f32 %v29_v4 }
   0x5   :  { %7 = vsyncpa [#allocation4], 0  ;;  %148 = vlog2.f32 %v30_v5  ;;  %v49_v8 = vsub.f32 1.0, %v21_v0  ;;  %v50_v9 = vsub.f32 1.0, %v22_v1  ;;  %v51_v10 = vsub.f32 1.0, %v23_v2  ;;  %v17_v18 = vld [vmem:[%s227_s0] sm:$0xff] }
   0x6   :  { %150 = vlog2.f32 %v31_v6  ;;  %v52_v11 = vsub.f32 1.0, %v24_v3  ;;  %v77_v16 = vlaneseq  ;;  %v18_v20 = vld [vmem:[%s227_s0 + $0x8] sm:$0xff]  ;;  %v19_v23 = vld [vmem:[%s227_s0 + $0x10] sm:$0xff]  ;;  %v20_v26 = vld [vmem:[%s227_s0 + $0x18] sm:$0xff]  ;;  %v25_v27 = vmul.f32 2.0, %v17_v18  ;;  %s184_s0 = smov [#allocation3]  }
   0x7   :  { %152 = vlog2.f32 %v32_v7  ;;  %v53_v12 = vadd.f32 1e-07, %v49_v8  ;;  %v54_v13 = vadd.f32 1e-07, %v50_v9  ;;  %v55_v14 = vadd.f32 1e-07, %v51_v10 }
   0x8   :  { %v56_v15 = vadd.f32 1e-07, %v52_v11  ;;  %v78_v17 = vshrl.u32 %v77_v16, 7  ;;  %v26_v31 = vmul.f32 2.0, %v18_v20  ;;  %v83_v33 = vand.u32 127, %v77_v16  ;;  %s135_s24 = sshll.u32 %s184_s0, 4  ;;  %s136_s24 = int_to_ptr.vmem [resolvable:$true] %s135_s24 }
   0x9   :  { %154 = vlog2.f32 %v53_v12  ;;  %v27_v35 = vmul.f32 2.0, %v19_v23  ;;  %v45_v37 = vsub.f32 1.0, %v17_v18  ;;  %v28_v40 = vmul.f32 2.0, %v20_v26  ;;  %s162_s27 = scalar_lea.vmem %s136_s24, 16  ;;  %s166_s28 = scalar_lea.vmem %s136_s24, 32 }
   0xa   :  { %156 = vlog2.f32 %v54_v13  ;;  %v79_v21 = vadd.s32 8, %v78_v17  ;;  %v80_v24 = vadd.s32 16, %v78_v17  ;;  %v81_v29 = vadd.s32 24, %v78_v17  ;;  %p163_p0 = scmp.ne.s32.totalorder %s136_s24, %s162_s27  ;;  %p167_p1 = scmp.lt.s32.totalorder %s136_s24, %s136_s24 }
   0xb   :  { %158 = vlog2.f32 %v55_v14  ;;  %v90_v34 = vmul.u32 128, %v78_v17  ;;  %v46_v42 = vsub.f32 1.0, %v18_v20  ;;  %v47_v46 = vsub.f32 1.0, %v19_v23  ;;  %p168_p2 = scmp.lt.s32.totalorder %s166_s28, %s162_s27 }
   0xc   :  { %160 = vlog2.f32 %v56_v15  ;;  %v91_v38 = vmul.u32 128, %v79_v21  ;;  %v92_v43 = vmul.u32 128, %v80_v24  ;;  %v48_v51 = vsub.f32 1.0, %v20_v26 }
   0xd   :  { %v93_v48 = vmul.u32 128, %v81_v29  ;;  %v94_v53 = vadd.s32 %v90_v34, %v83_v33  ;;  %vm127_vm4 = vcmask 0   ;;  %p169_p3 = por %p168_p2, %p167_p1 }
   0xe   :  { %v95_v58 = vadd.s32 %v91_v38, %v83_v33  ;;  %v96_v62 = vadd.s32 %v92_v43, %v83_v33 }
   0xf   :  { %v97_v1 = vadd.s32 %v93_v48, %v83_v33  ;;  %vm98_vm0 = vcmp.lt.s32.totalorder %v94_v53, 64  ;;  %p170_p4 = pnand %p169_p3, %p163_p0 }
  0x10   :  { %vm99_vm1 = vcmp.lt.s32.totalorder %v95_v58, 64  ;;  %vm100_vm2 = vcmp.lt.s32.totalorder %v96_v62, 64 }
  0x11   :  { %v147_v19 = vpop.eup %146  ;;  %vm101_vm3 = vcmp.lt.s32.totalorder %v97_v1, 64 }
  0x12   :  { %v149_v22 = vpop.eup %148  ;;  %v34_v28 = vmul.f32 0.6931472, %v147_v19 }
  0x13   :  { %v151_v25 = vpop.eup %150  ;;  %v36_v32 = vmul.f32 0.6931472, %v149_v22 }
  0x14   :  { %v153_v30 = vpop.eup %152  ;;  %v38_v36 = vmul.f32 0.6931472, %v151_v25  ;;  %v41_v45 = vmul.f32 %v34_v28, %v25_v27 }
  0x15   :  { %v40_v41 = vmul.f32 0.6931472, %v153_v30  ;;  %v42_v50 = vmul.f32 %v36_v32, %v26_v31 }
  0x16   :  { %v155_v39 = vpop.eup %154  ;;  %v43_v55 = vmul.f32 %v38_v36, %v27_v35 }
  0x17   :  { %v157_v44 = vpop.eup %156  ;;  %v58_v47 = vmul.f32 0.6931472, %v155_v39  ;;  %v44_v59 = vmul.f32 %v40_v41, %v28_v40 }
  0x18   :  { %v159_v49 = vpop.eup %158  ;;  %v60_v52 = vmul.f32 0.6931472, %v157_v44 }
  0x19   :  { %v161_v54 = vpop.eup %160  ;;  %v62_v56 = vmul.f32 0.6931472, %v159_v49  ;;  %v65_v57 = vmul.f32 %v58_v47, %v45_v37 }
  0x1a   :  { %v64_v60 = vmul.f32 0.6931472, %v161_v54  ;;  %v66_v61 = vmul.f32 %v60_v52, %v46_v42 }
  0x1b   :  { %v67_v63 = vmul.f32 %v62_v56, %v47_v46  ;;  %v69_v0 = vadd.f32 %v65_v57, %v41_v45 }
  0x1c   :  { %v68_v2 = vmul.f32 %v64_v60, %v48_v51  ;;  %v70_v3 = vadd.f32 %v66_v61, %v42_v50 }
  0x1d   :  { %v71_v4 = vadd.f32 %v67_v63, %v43_v55  ;;  %v73_v5 = vsub.f32 0.0, %v69_v0 }
  0x1e   :  { %v72_v6 = vadd.f32 %v68_v2, %v44_v59  ;;  %v74_v7 = vsub.f32 0.0, %v70_v3 }
  0x1f   :  { %v75_v8 = vsub.f32 0.0, %v71_v4  ;;  %v102_v9 = vsel %vm98_vm0, %v73_v5, 0.0 }
  0x20   :  { %v76_v10 = vsub.f32 0.0, %v72_v6  ;;  %v103_v11 = vsel %vm99_vm1, %v74_v7, 0.0 }
  0x21   :  { %v104_v12 = vsel %vm100_vm2, %v75_v8, 0.0  ;;  %v107_v13 = vadd.f32 %v103_v11, %v102_v9 }
  0x22   :  { %v105_v14 = vsel %vm101_vm3, %v76_v10, 0.0 }
  0x23   :  { %v108_v15 = vadd.f32 %v107_v13, %v104_v12 }
  0x25   :  { %v109_v16 = vadd.f32 %v108_v15, %v105_v14 }
  0x27   :  { %116 = vadd.xlane.f32.xlu0 %v109_v16 }
  0xb0   :  { %v117_v17 = vpop.xlane.xlu0 %116 }
  0xb1   :  { %v118_v18 = vrot.slane %v117_v17, 4 }
  0xb3   :  { %v119_v19 = vadd.f32 %v118_v18, %v117_v17 }
  0xb5   :  { %v120_v20 = vrot.slane %v119_v19, 2 }
  0xb7   :  { %v121_v21 = vadd.f32 %v120_v20, %v119_v19 }
  0xb9   :  { %v122_v22 = vrot.slane %v121_v21, 1 }
  0xbb   :  { %v123_v23 = vadd.f32 %v122_v22, %v121_v21 }
  0xbd   :  { %143 = vpush %v123_v23 }
  0xee   :  { %s144_s25 = spop %143 }
  0xef   :  { %s125_s26 = smul.f32 0.015625, %s144_s25 }
  0xf1   :  { %v126_v24 = vstv %s125_s26 }
  0xf2   :  { %128 = vst.msk [vmem:[#allocation3] sm:$0x1] %vm127_vm4, %v126_v24 }
  0xf3   :  { %173 = shalt.err (!%p170_p4)
}
  0xf4   :  { %138 = dma.vmem_to_hbm [thread:$0]  %s136_s24, 16, %s229_s2, [#allocation4]  }
  0xf5   :  { %182 = dma.done.wait [#allocation4], 16  }
  0xf6   :  { %183 = vsyncadd [#allocation4], 4294967280 }
  0xf7   :  { %142 = vsyncpa [#allocation4], 1 }

</bundles_post_ra>
